<compile_context>
chip_gen: v7x
topology: tpu7x:2x2x1
jax: 0.10.0
libtpu: 0.0.40
codegen_flags: <defaults>
</compile_context>

<pallas_src>
import jax
import jax.numpy as jnp
from jax.experimental import pallas as pl
from jax.experimental.pallas import tpu as pltpu


def _fold128(v, op):
    """Pre-reduce 128-lane halves on the VPU so the final cross-lane (XLU) reduction
    tree only ever spans 128 lanes. No-op when the last dim is not a multiple of 256."""
    n = v.shape[-1]
    while n > 128 and n % 256 == 0:
        h = n // 2
        v = op(v[..., :h], v[..., h:])
        n = h
    return v


def _attention_auto_kernel(x_ref, m_ref, o_ref):
    """x_ref: (TB, C*HW) VMEM; m_ref: (HW, HW) bf16 conv matrix (1/C folded in);
    o_ref: (TB, C)."""
    tb = x_ref.shape[0]
    hw = m_ref.shape[0]
    c = x_ref.shape[1] // hw

    # 1) channel-wise sum of squares -> (TB, HW). Channel slices start at multiples of
    #    HW (a multiple of 128), so each read is a plain aligned vld, no relayout.
    ssq = None
    for ci in range(c):
        xc = x_ref[:, ci * hw:(ci + 1) * hw].astype(jnp.float32)
        ssq = xc * xc if ssq is None else ssq + xc * xc

    # 2) 3x3 SAME conv (and the 1/C of the channel mean) as ONE bf16 MXU pass with
    #    f32 accumulation. Conv bias omitted: softmax is shift-invariant, it cancels.
    conv = jnp.dot(ssq.astype(jnp.bfloat16), m_ref[...],
                   preferred_element_type=jnp.float32)              # (TB, HW)

    # 3) softmax numerator / denominator over the flattened spatial axis.
    mx = jnp.max(_fold128(conv, jnp.maximum), axis=-1, keepdims=True)
    e = jnp.exp(conv - mx)                                          # (TB, HW)
    s = jnp.sum(_fold128(e, jnp.add), axis=-1, keepdims=True)       # (TB, 1)
    inv_s = pl.reciprocal(s, approx=True)                           # EUP slot

    # 4) per-channel attention-weighted spatial sum -> (TB, C); normalize only the
    #    tiny accumulator (not the (TB, HW) weights). Columns are placed with a
    #    one-hot select to keep every intermediate >= 2-D and trivially lowerable.
    lane_idx = jax.lax.broadcasted_iota(jnp.int32, (1, c), 1)       # (1, C)
    acc = jnp.zeros((tb, c), dtype=jnp.float32)
    for ci in range(c):
        xc = x_ref[:, ci * hw:(ci + 1) * hw].astype(jnp.float32)
        col = jnp.sum(_fold128(e * xc, jnp.add), axis=-1, keepdims=True)   # (TB, 1)
        acc = acc + jnp.where(lane_idx == ci, col, 0.0)
    o_ref[...] = (acc * inv_s).astype(o_ref.dtype)


def _conv3x3_same_matrix(conv_w, H, W, scale=1.0):
    """(HW, HW) matrix M such that conv(fmap).reshape(B, HW) == fmap.reshape(B, HW) @ M
    for a 1->1 channel, 3x3, padding=1 (SAME) cross-correlation, times `scale`."""
    HW = H * W
    deltas = jnp.eye(HW, dtype=jnp.float32).reshape(HW, 1, H, W)
    resp = jax.lax.conv_general_dilated(
        deltas, conv_w.reshape(1, 1, 3, 3).astype(jnp.float32),
        window_strides=(1, 1), padding="SAME",
        dimension_numbers=("NCHW", "OIHW", "NCHW"),
        precision=jax.lax.Precision.HIGHEST)
    return resp.reshape(HW, HW) * scale   # M[p, q] = weight of input pixel p in output q


def attention_auto(x, conv_w, *, input_dtype=None):
    """x: (B, C, H, W) -> (B, C) attention-weighted spatial sum."""
    B, C, H, W = x.shape
    HW = H * W
    orig_dtype = x.dtype
    if input_dtype is not None:              # e.g. jnp.bfloat16 on v5e to halve HBM bytes
        x = x.astype(input_dtype)
    x_flat = x.reshape(B, C * HW)            # free reshape; minor dims (B, C*HW) lane-dense

    # Pad batch to a multiple of 8 (sublane-aligned). Padded rows are all-zero ->
    # uniform softmax over zeros -> zero output rows, sliced off below.
    Bp = ((B + 7) // 8) * 8
    if Bp != B:
        x_flat = jnp.pad(x_flat, ((0, Bp - B), (0, 0)))

    # Host-built conv matrix with the channel-mean 1/C folded in; bf16 for a single
    # MXU pass and half the resident VMEM. Dense (HW, HW) is only a valid strategy
    # while HW^2 fits VMEM (kernel_size <~ 32-45); beyond that it must be tiled.
    conv_matrix = _conv3x3_same_matrix(conv_w, H, W, scale=1.0 / C).astype(jnp.bfloat16)
    matrix_bytes = conv_matrix.size * conv_matrix.dtype.itemsize

    # Generation-aware VMEM budget (v7x: 64 MiB per core vs 128 MiB on v5e/v6e).
    vmem_cap = 64 << 20
    try:
        vmem_cap = int(pltpu.get_tpu_info().vmem_capacity_bytes)
    except Exception:
        pass

    bytes_per_row = C * HW * x_flat.dtype.itemsize
    x_block_budget = max(1 << 20, vmem_cap // 6 - matrix_bytes)
    tb = max(8, (x_block_budget // bytes_per_row) // 8 * 8)
    if Bp >= 16:                              # v7x megacore: keep >= 2 grid steps
        tb = min(tb, max(8, (Bp // 2) // 8 * 8))
    tb = min(tb, Bp)
    while Bp % tb:
        tb -= 8
    grid = (Bp // tb,)

    x_block_bytes = tb * bytes_per_row
    out_block_bytes = tb * C * jnp.dtype(orig_dtype).itemsize
    inter_bytes = 4 * tb * HW * 4             # ssq / conv / e / e*x f32 working set bound
    vmem_need = 2 * x_block_bytes + 2 * matrix_bytes + 2 * out_block_bytes + inter_bytes
    vmem_limit = int(min(vmem_cap, max(vmem_need + (4 << 20), 32 << 20)))

    def run(matrix_pipeline_mode):
        if matrix_pipeline_mode is not None:
            matrix_spec = pl.BlockSpec((HW, HW), lambda i: (0, 0),
                                       pipeline_mode=matrix_pipeline_mode)
        else:
            matrix_spec = pl.BlockSpec((HW, HW), lambda i: (0, 0))
        out = pl.pallas_call(
            _attention_auto_kernel,
            out_shape=jax.ShapeDtypeStruct((Bp, C), orig_dtype),
            grid=grid,
            in_specs=[
                pl.BlockSpec((tb, C * HW), lambda i: (i, 0)),   # x tile (pipelined)
                matrix_spec,                                    # conv matrix (resident)
            ],
            out_specs=pl.BlockSpec((tb, C), lambda i: (i, 0)),
            compiler_params=pltpu.CompilerParams(
                dimension_semantics=("parallel",),              # megacore split on v7x
                vmem_limit_bytes=vmem_limit,
            ),
        )(x_flat, conv_matrix)
        return out

    try:
        # Constant operand: a single buffer saves matrix_bytes of VMEM.
        out = jax.block_until_ready(run(pl.Buffered(1)))
    except Exception:
        # Fallback if this jax version rejects buffer_count=1.
        out = run(None)
    return out[:B]


def reference(x, conv_w, conv_b):
    """Pure-JAX reference of the (assumed) PyTorch forward."""
    B, C, H, W = x.shape
    fmap = jnp.mean(x * x, axis=1)[:, None]                    # (B, 1, H, W)
    conv = jax.lax.conv_general_dilated(
        fmap, conv_w.reshape(1, 1, 3, 3), window_strides=(1, 1),
        padding="SAME", dimension_numbers=("NCHW", "OIHW", "NCHW"),
        precision=jax.lax.Precision.HIGHEST)
    conv = conv + conv_b[0]
    wgt = jax.nn.softmax(conv.reshape(B, H * W), axis=-1).reshape(B, 1, H, W)
    return jnp.sum(wgt * x, axis=(2, 3))


if __name__ == "__main__":
    B, C, H, W = 2, 4, 16, 16   # kernel_size = 16

    key = jax.random.PRNGKey(0)
    x = jax.random.normal(key, (B, C, H, W), dtype=jnp.float32)

    # Deterministic conv parameter init (synthetic, no checkpoint load).
    conv_w = (jnp.arange(9, dtype=jnp.float32).reshape(3, 3) * 0.1 - 0.4)
    conv_b = jnp.array([0.05], dtype=jnp.float32)

    out = attention_auto(x, conv_w)
    out = jax.block_until_ready(out)

    ref = reference(x, conv_w, conv_b)
    assert out.shape == (B, C)
    # Tolerance loosened vs f32-HIGHEST: single-pass bf16 MXU conv + approx reciprocal.
    assert jnp.allclose(out, ref, atol=1e-2, rtol=1e-2), (out, ref)
    print("KERNEL_OK")
</pallas_src>

<mosaic_0001>
module attributes {stable_mosaic.version = 11 : i64} {
  func.func @_attention_auto_kernel(%arg0: i32, %arg1: memref<8x1024xf32, #tpu.memory_space<vmem>>, %arg2: memref<256x256xbf16, #tpu.memory_space<vmem>>, %arg3: memref<8x4xf32, #tpu.memory_space<vmem>>) attributes {dimension_semantics = [#tpu.dimension_semantics<parallel>], iteration_bounds = array<i64: 1>, scalar_prefetch = 0 : i64, scratch_operands = 0 : i64, tpu.core_type = #tpu.core_type<tc>, window_params = [{transform_indices = @transform_0, window_bounds = array<i64: 8, 1024>}, {pipeline_mode = #tpu.pipeline_mode<synchronous>, transform_indices = @transform_1, window_bounds = array<i64: 256, 256>}, {transform_indices = @transform_2, window_bounds = array<i64: 8, 4>}]} {
    %c0 = arith.constant 0 : index
    %c0_0 = arith.constant 0 : index
    %0 = vector.load %arg1[%c0, %c0_0] : memref<8x1024xf32, #tpu.memory_space<vmem>>, vector<8x256xf32>
    %1 = arith.mulf %0, %0 : vector<8x256xf32>
    %c0_1 = arith.constant 0 : index
    %c256 = arith.constant 256 : index
    %2 = vector.load %arg1[%c0_1, %c256] : memref<8x1024xf32, #tpu.memory_space<vmem>>, vector<8x256xf32>
    %3 = arith.mulf %2, %2 : vector<8x256xf32>
    %4 = arith.addf %1, %3 : vector<8x256xf32>
    %c0_2 = arith.constant 0 : index
    %c512 = arith.constant 512 : index
    %5 = vector.load %arg1[%c0_2, %c512] : memref<8x1024xf32, #tpu.memory_space<vmem>>, vector<8x256xf32>
    %6 = arith.mulf %5, %5 : vector<8x256xf32>
    %7 = arith.addf %4, %6 : vector<8x256xf32>
    %c0_3 = arith.constant 0 : index
    %c768 = arith.constant 768 : index
    %8 = vector.load %arg1[%c0_3, %c768] : memref<8x1024xf32, #tpu.memory_space<vmem>>, vector<8x256xf32>
    %9 = arith.mulf %8, %8 : vector<8x256xf32>
    %10 = arith.addf %7, %9 : vector<8x256xf32>
    %11 = arith.truncf %10 : vector<8x256xf32> to vector<8x256xbf16>
    %c0_4 = arith.constant 0 : index
    %c0_5 = arith.constant 0 : index
    %12 = vector.load %arg2[%c0_4, %c0_5] : memref<256x256xbf16, #tpu.memory_space<vmem>>, vector<256x256xbf16>
    %cst = arith.constant dense<0.000000e+00> : vector<8x256xf32>
    %13 = tpu.matmul %11, %12, %cst {dimension_numbers = #tpu.dot_dimension_numbers<[1], [0], [0], [1], [0, 0, 1, 1], [], []>} : vector<8x256xbf16>, vector<256x256xbf16>, vector<8x256xf32> -> vector<8x256xf32>
    %14 = vector.extract_strided_slice %13 {offsets = [0, 0], sizes = [8, 128], strides = [1, 1]} : vector<8x256xf32> to vector<8x128xf32>
    %15 = vector.extract_strided_slice %13 {offsets = [0, 128], sizes = [8, 128], strides = [1, 1]} : vector<8x256xf32> to vector<8x128xf32>
    %16 = arith.maximumf %14, %15 : vector<8x128xf32>
    %cst_6 = arith.constant dense<0xFF800000> : vector<8xf32>
    %17 = vector.multi_reduction <maximumf>, %16, %cst_6 [1] : vector<8x128xf32> to vector<8xf32>
    %18 = vector.shape_cast %17 : vector<8xf32> to vector<8x1xf32>
    %19 = vector.broadcast %18 : vector<8x1xf32> to vector<8x256xf32>
    %20 = arith.subf %13, %19 : vector<8x256xf32>
    %21 = math.exp %20 : vector<8x256xf32>
    %22 = vector.extract_strided_slice %21 {offsets = [0, 0], sizes = [8, 128], strides = [1, 1]} : vector<8x256xf32> to vector<8x128xf32>
    %23 = vector.extract_strided_slice %21 {offsets = [0, 128], sizes = [8, 128], strides = [1, 1]} : vector<8x256xf32> to vector<8x128xf32>
    %24 = arith.addf %22, %23 : vector<8x128xf32>
    %cst_7 = arith.constant dense<0.000000e+00> : vector<8xf32>
    %25 = vector.multi_reduction <add>, %24, %cst_7 [1] : vector<8x128xf32> to vector<8xf32>
    %26 = vector.shape_cast %25 : vector<8xf32> to vector<8x1xf32>
    %27 = tpu.reciprocal %26 {approx = true} : vector<8x1xf32> -> vector<8x1xf32>
    %28 = tpu.iota {dimensions = array<i32: 1>} : vector<1x4xi32>
    %cst_8 = arith.constant 0.000000e+00 : f32
    %29 = vector.broadcast %cst_8 : f32 to vector<8x4xf32>
    %c0_9 = arith.constant 0 : index
    %c0_10 = arith.constant 0 : index
    %30 = vector.load %arg1[%c0_9, %c0_10] : memref<8x1024xf32, #tpu.memory_space<vmem>>, vector<8x256xf32>
    %31 = arith.mulf %21, %30 : vector<8x256xf32>
    %32 = vector.extract_strided_slice %31 {offsets = [0, 0], sizes = [8, 128], strides = [1, 1]} : vector<8x256xf32> to vector<8x128xf32>
    %33 = vector.extract_strided_slice %31 {offsets = [0, 128], sizes = [8, 128], strides = [1, 1]} : vector<8x256xf32> to vector<8x128xf32>
    %34 = arith.addf %32, %33 : vector<8x128xf32>
    %cst_11 = arith.constant dense<0.000000e+00> : vector<8xf32>
    %35 = vector.multi_reduction <add>, %34, %cst_11 [1] : vector<8x128xf32> to vector<8xf32>
    %36 = vector.shape_cast %35 : vector<8xf32> to vector<8x1xf32>
    %c0_i32 = arith.constant 0 : i32
    %37 = vector.broadcast %c0_i32 : i32 to vector<1x4xi32>
    %38 = arith.cmpi eq, %28, %37 : vector<1x4xi32>
    %cst_12 = arith.constant 0.000000e+00 : f32
    %39 = vector.shape_cast %38 : vector<1x4xi1> to vector<1x4xi1>
    %40 = vector.broadcast %39 : vector<1x4xi1> to vector<8x4xi1>
    %41 = vector.shape_cast %36 : vector<8x1xf32> to vector<8x1xf32>
    %42 = vector.broadcast %41 : vector<8x1xf32> to vector<8x4xf32>
    %43 = vector.broadcast %cst_12 : f32 to vector<8x4xf32>
    %44 = arith.select %40, %42, %43 : vector<8x4xi1>, vector<8x4xf32>
    %45 = arith.addf %29, %44 : vector<8x4xf32>
    %c0_13 = arith.constant 0 : index
    %c256_14 = arith.constant 256 : index
    %46 = vector.load %arg1[%c0_13, %c256_14] : memref<8x1024xf32, #tpu.memory_space<vmem>>, vector<8x256xf32>
    %47 = arith.mulf %21, %46 : vector<8x256xf32>
    %48 = vector.extract_strided_slice %47 {offsets = [0, 0], sizes = [8, 128], strides = [1, 1]} : vector<8x256xf32> to vector<8x128xf32>
    %49 = vector.extract_strided_slice %47 {offsets = [0, 128], sizes = [8, 128], strides = [1, 1]} : vector<8x256xf32> to vector<8x128xf32>
    %50 = arith.addf %48, %49 : vector<8x128xf32>
    %cst_15 = arith.constant dense<0.000000e+00> : vector<8xf32>
    %51 = vector.multi_reduction <add>, %50, %cst_15 [1] : vector<8x128xf32> to vector<8xf32>
    %52 = vector.shape_cast %51 : vector<8xf32> to vector<8x1xf32>
    %c1_i32 = arith.constant 1 : i32
    %53 = vector.broadcast %c1_i32 : i32 to vector<1x4xi32>
    %54 = arith.cmpi eq, %28, %53 : vector<1x4xi32>
    %cst_16 = arith.constant 0.000000e+00 : f32
    %55 = vector.shape_cast %54 : vector<1x4xi1> to vector<1x4xi1>
    %56 = vector.broadcast %55 : vector<1x4xi1> to vector<8x4xi1>
    %57 = vector.shape_cast %52 : vector<8x1xf32> to vector<8x1xf32>
    %58 = vector.broadcast %57 : vector<8x1xf32> to vector<8x4xf32>
    %59 = vector.broadcast %cst_16 : f32 to vector<8x4xf32>
    %60 = arith.select %56, %58, %59 : vector<8x4xi1>, vector<8x4xf32>
    %61 = arith.addf %45, %60 : vector<8x4xf32>
    %c0_17 = arith.constant 0 : index
    %c512_18 = arith.constant 512 : index
    %62 = vector.load %arg1[%c0_17, %c512_18] : memref<8x1024xf32, #tpu.memory_space<vmem>>, vector<8x256xf32>
    %63 = arith.mulf %21, %62 : vector<8x256xf32>
    %64 = vector.extract_strided_slice %63 {offsets = [0, 0], sizes = [8, 128], strides = [1, 1]} : vector<8x256xf32> to vector<8x128xf32>
    %65 = vector.extract_strided_slice %63 {offsets = [0, 128], sizes = [8, 128], strides = [1, 1]} : vector<8x256xf32> to vector<8x128xf32>
    %66 = arith.addf %64, %65 : vector<8x128xf32>
    %cst_19 = arith.constant dense<0.000000e+00> : vector<8xf32>
    %67 = vector.multi_reduction <add>, %66, %cst_19 [1] : vector<8x128xf32> to vector<8xf32>
    %68 = vector.shape_cast %67 : vector<8xf32> to vector<8x1xf32>
    %c2_i32 = arith.constant 2 : i32
    %69 = vector.broadcast %c2_i32 : i32 to vector<1x4xi32>
    %70 = arith.cmpi eq, %28, %69 : vector<1x4xi32>
    %cst_20 = arith.constant 0.000000e+00 : f32
    %71 = vector.shape_cast %70 : vector<1x4xi1> to vector<1x4xi1>
    %72 = vector.broadcast %71 : vector<1x4xi1> to vector<8x4xi1>
    %73 = vector.shape_cast %68 : vector<8x1xf32> to vector<8x1xf32>
    %74 = vector.broadcast %73 : vector<8x1xf32> to vector<8x4xf32>
    %75 = vector.broadcast %cst_20 : f32 to vector<8x4xf32>
    %76 = arith.select %72, %74, %75 : vector<8x4xi1>, vector<8x4xf32>
    %77 = arith.addf %61, %76 : vector<8x4xf32>
    %c0_21 = arith.constant 0 : index
    %c768_22 = arith.constant 768 : index
    %78 = vector.load %arg1[%c0_21, %c768_22] : memref<8x1024xf32, #tpu.memory_space<vmem>>, vector<8x256xf32>
    %79 = arith.mulf %21, %78 : vector<8x256xf32>
    %80 = vector.extract_strided_slice %79 {offsets = [0, 0], sizes = [8, 128], strides = [1, 1]} : vector<8x256xf32> to vector<8x128xf32>
    %81 = vector.extract_strided_slice %79 {offsets = [0, 128], sizes = [8, 128], strides = [1, 1]} : vector<8x256xf32> to vector<8x128xf32>
    %82 = arith.addf %80, %81 : vector<8x128xf32>
    %cst_23 = arith.constant dense<0.000000e+00> : vector<8xf32>
    %83 = vector.multi_reduction <add>, %82, %cst_23 [1] : vector<8x128xf32> to vector<8xf32>
    %84 = vector.shape_cast %83 : vector<8xf32> to vector<8x1xf32>
    %c3_i32 = arith.constant 3 : i32
    %85 = vector.broadcast %c3_i32 : i32 to vector<1x4xi32>
    %86 = arith.cmpi eq, %28, %85 : vector<1x4xi32>
    %cst_24 = arith.constant 0.000000e+00 : f32
    %87 = vector.shape_cast %86 : vector<1x4xi1> to vector<1x4xi1>
    %88 = vector.broadcast %87 : vector<1x4xi1> to vector<8x4xi1>
    %89 = vector.shape_cast %84 : vector<8x1xf32> to vector<8x1xf32>
    %90 = vector.broadcast %89 : vector<8x1xf32> to vector<8x4xf32>
    %91 = vector.broadcast %cst_24 : f32 to vector<8x4xf32>
    %92 = arith.select %88, %90, %91 : vector<8x4xi1>, vector<8x4xf32>
    %93 = arith.addf %77, %92 : vector<8x4xf32>
    %94 = vector.broadcast %27 : vector<8x1xf32> to vector<8x4xf32>
    %95 = arith.mulf %93, %94 : vector<8x4xf32>
    %c0_25 = arith.constant 0 : index
    %c0_26 = arith.constant 0 : index
    %96 = vector.load %arg3[%c0_25, %c0_26] : memref<8x4xf32, #tpu.memory_space<vmem>>, vector<8x4xf32>
    tpu.vector_store %arg3[%c0_25, %c0_26], %95 {strides = array<i32>} : memref<8x4xf32, #tpu.memory_space<vmem>>, vector<8x4xf32>,
    return
  }
  func.func @transform_0(%arg0: i32) -> (i32, i32) {
    %c0_i32 = arith.constant 0 : i32
    %c0_i32_0 = arith.constant 0 : i32
    return %arg0, %c0_i32 : i32, i32
  }
  func.func @transform_1(%arg0: i32) -> (i32, i32) {
    %c0_i32 = arith.constant 0 : i32
    %c0_i32_0 = arith.constant 0 : i32
    %c0_i32_1 = arith.constant 0 : i32
    return %c0_i32, %c0_i32_0 : i32, i32
  }
  func.func @transform_2(%arg0: i32) -> (i32, i32) {
    %c0_i32 = arith.constant 0 : i32
    %c0_i32_0 = arith.constant 0 : i32
    return %arg0, %c0_i32 : i32, i32
  }
}

module attributes {stable_mosaic.version = 11 : i64} {
  func.func @_attention_auto_kernel(%arg0: i32, %arg1: memref<8x1024xf32, #tpu.memory_space<vmem>>, %arg2: memref<256x256xbf16, #tpu.memory_space<vmem>>, %arg3: memref<8x4xf32, #tpu.memory_space<vmem>>) attributes {dimension_semantics = [#tpu.dimension_semantics<parallel>], iteration_bounds = array<i64: 1>, scalar_prefetch = 0 : i64, scratch_operands = 0 : i64, tpu.core_type = #tpu.core_type<tc>, window_params = [{transform_indices = @transform_0, window_bounds = array<i64: 8, 1024>}, {pipeline_mode = #tpu.pipeline_mode<synchronous>, transform_indices = @transform_1, window_bounds = array<i64: 256, 256>}, {transform_indices = @transform_2, window_bounds = array<i64: 8, 4>}]} {
    %c0 = arith.constant 0 : index
    %c0_0 = arith.constant 0 : index
    %0 = vector.load %arg1[%c0, %c0_0] : memref<8x1024xf32, #tpu.memory_space<vmem>>, vector<8x256xf32>
    %1 = arith.mulf %0, %0 : vector<8x256xf32>
    %c0_1 = arith.constant 0 : index
    %c256 = arith.constant 256 : index
    %2 = vector.load %arg1[%c0_1, %c256] : memref<8x1024xf32, #tpu.memory_space<vmem>>, vector<8x256xf32>
    %3 = arith.mulf %2, %2 : vector<8x256xf32>
    %4 = arith.addf %1, %3 : vector<8x256xf32>
    %c0_2 = arith.constant 0 : index
    %c512 = arith.constant 512 : index
    %5 = vector.load %arg1[%c0_2, %c512] : memref<8x1024xf32, #tpu.memory_space<vmem>>, vector<8x256xf32>
    %6 = arith.mulf %5, %5 : vector<8x256xf32>
    %7 = arith.addf %4, %6 : vector<8x256xf32>
    %c0_3 = arith.constant 0 : index
    %c768 = arith.constant 768 : index
    %8 = vector.load %arg1[%c0_3, %c768] : memref<8x1024xf32, #tpu.memory_space<vmem>>, vector<8x256xf32>
    %9 = arith.mulf %8, %8 : vector<8x256xf32>
    %10 = arith.addf %7, %9 : vector<8x256xf32>
    %11 = arith.truncf %10 : vector<8x256xf32> to vector<8x256xbf16>
    %c0_4 = arith.constant 0 : index
    %c0_5 = arith.constant 0 : index
    %12 = vector.load %arg2[%c0_4, %c0_5] : memref<256x256xbf16, #tpu.memory_space<vmem>>, vector<256x256xbf16>
    %cst = arith.constant dense<0.000000e+00> : vector<8x256xf32>
    %13 = tpu.matmul %11, %12, %cst {dimension_numbers = #tpu.dot_dimension_numbers<[1], [0], [0], [1], [0, 0, 1, 1], [], []>} : vector<8x256xbf16>, vector<256x256xbf16>, vector<8x256xf32> -> vector<8x256xf32>
    %14 = vector.extract_strided_slice %13 {offsets = [0, 0], sizes = [8, 128], strides = [1, 1]} : vector<8x256xf32> to vector<8x128xf32>
    %15 = vector.extract_strided_slice %13 {offsets = [0, 128], sizes = [8, 128], strides = [1, 1]} : vector<8x256xf32> to vector<8x128xf32>
    %16 = arith.maximumf %14, %15 : vector<8x128xf32>
    %cst_6 = arith.constant dense<0xFF800000> : vector<8xf32>
    %17 = vector.multi_reduction <maximumf>, %16, %cst_6 [1] : vector<8x128xf32> to vector<8xf32>
    %18 = vector.shape_cast %17 : vector<8xf32> to vector<8x1xf32>
    %19 = vector.broadcast %18 : vector<8x1xf32> to vector<8x256xf32>
    %20 = arith.subf %13, %19 : vector<8x256xf32>
    %21 = math.exp %20 : vector<8x256xf32>
    %22 = vector.extract_strided_slice %21 {offsets = [0, 0], sizes = [8, 128], strides = [1, 1]} : vector<8x256xf32> to vector<8x128xf32>
    %23 = vector.extract_strided_slice %21 {offsets = [0, 128], sizes = [8, 128], strides = [1, 1]} : vector<8x256xf32> to vector<8x128xf32>
    %24 = arith.addf %22, %23 : vector<8x128xf32>
    %cst_7 = arith.constant dense<0.000000e+00> : vector<8xf32>
    %25 = vector.multi_reduction <add>, %24, %cst_7 [1] : vector<8x128xf32> to vector<8xf32>
    %26 = vector.shape_cast %25 : vector<8xf32> to vector<8x1xf32>
    %27 = tpu.reciprocal %26 {approx = true} : vector<8x1xf32> -> vector<8x1xf32>
    %28 = tpu.iota {dimensions = array<i32: 1>} : vector<1x4xi32>
    %cst_8 = arith.constant 0.000000e+00 : f32
    %29 = vector.broadcast %cst_8 : f32 to vector<8x4xf32>
    %c0_9 = arith.constant 0 : index
    %c0_10 = arith.constant 0 : index
    %30 = vector.load %arg1[%c0_9, %c0_10] : memref<8x1024xf32, #tpu.memory_space<vmem>>, vector<8x256xf32>
    %31 = arith.mulf %21, %30 : vector<8x256xf32>
    %32 = vector.extract_strided_slice %31 {offsets = [0, 0], sizes = [8, 128], strides = [1, 1]} : vector<8x256xf32> to vector<8x128xf32>
    %33 = vector.extract_strided_slice %31 {offsets = [0, 128], sizes = [8, 128], strides = [1, 1]} : vector<8x256xf32> to vector<8x128xf32>
    %34 = arith.addf %32, %33 : vector<8x128xf32>
    %cst_11 = arith.constant dense<0.000000e+00> : vector<8xf32>
    %35 = vector.multi_reduction <add>, %34, %cst_11 [1] : vector<8x128xf32> to vector<8xf32>
    %36 = vector.shape_cast %35 : vector<8xf32> to vector<8x1xf32>
    %c0_i32 = arith.constant 0 : i32
    %37 = vector.broadcast %c0_i32 : i32 to vector<1x4xi32>
    %38 = arith.cmpi eq, %28, %37 : vector<1x4xi32>
    %cst_12 = arith.constant 0.000000e+00 : f32
    %39 = vector.shape_cast %38 : vector<1x4xi1> to vector<1x4xi1>
    %40 = vector.broadcast %39 : vector<1x4xi1> to vector<8x4xi1>
    %41 = vector.shape_cast %36 : vector<8x1xf32> to vector<8x1xf32>
    %42 = vector.broadcast %41 : vector<8x1xf32> to vector<8x4xf32>
    %43 = vector.broadcast %cst_12 : f32 to vector<8x4xf32>
    %44 = arith.select %40, %42, %43 : vector<8x4xi1>, vector<8x4xf32>
    %45 = arith.addf %29, %44 : vector<8x4xf32>
    %c0_13 = arith.constant 0 : index
    %c256_14 = arith.constant 256 : index
    %46 = vector.load %arg1[%c0_13, %c256_14] : memref<8x1024xf32, #tpu.memory_space<vmem>>, vector<8x256xf32>
    %47 = arith.mulf %21, %46 : vector<8x256xf32>
    %48 = vector.extract_strided_slice %47 {offsets = [0, 0], sizes = [8, 128], strides = [1, 1]} : vector<8x256xf32> to vector<8x128xf32>
    %49 = vector.extract_strided_slice %47 {offsets = [0, 128], sizes = [8, 128], strides = [1, 1]} : vector<8x256xf32> to vector<8x128xf32>
    %50 = arith.addf %48, %49 : vector<8x128xf32>
    %cst_15 = arith.constant dense<0.000000e+00> : vector<8xf32>
    %51 = vector.multi_reduction <add>, %50, %cst_15 [1] : vector<8x128xf32> to vector<8xf32>
    %52 = vector.shape_cast %51 : vector<8xf32> to vector<8x1xf32>
    %c1_i32 = arith.constant 1 : i32
    %53 = vector.broadcast %c1_i32 : i32 to vector<1x4xi32>
    %54 = arith.cmpi eq, %28, %53 : vector<1x4xi32>
    %cst_16 = arith.constant 0.000000e+00 : f32
    %55 = vector.shape_cast %54 : vector<1x4xi1> to vector<1x4xi1>
    %56 = vector.broadcast %55 : vector<1x4xi1> to vector<8x4xi1>
    %57 = vector.shape_cast %52 : vector<8x1xf32> to vector<8x1xf32>
    %58 = vector.broadcast %57 : vector<8x1xf32> to vector<8x4xf32>
    %59 = vector.broadcast %cst_16 : f32 to vector<8x4xf32>
    %60 = arith.select %56, %58, %59 : vector<8x4xi1>, vector<8x4xf32>
    %61 = arith.addf %45, %60 : vector<8x4xf32>
    %c0_17 = arith.constant 0 : index
    %c512_18 = arith.constant 512 : index
    %62 = vector.load %arg1[%c0_17, %c512_18] : memref<8x1024xf32, #tpu.memory_space<vmem>>, vector<8x256xf32>
    %63 = arith.mulf %21, %62 : vector<8x256xf32>
    %64 = vector.extract_strided_slice %63 {offsets = [0, 0], sizes = [8, 128], strides = [1, 1]} : vector<8x256xf32> to vector<8x128xf32>
    %65 = vector.extract_strided_slice %63 {offsets = [0, 128], sizes = [8, 128], strides = [1, 1]} : vector<8x256xf32> to vector<8x128xf32>
    %66 = arith.addf %64, %65 : vector<8x128xf32>
    %cst_19 = arith.constant dense<0.000000e+00> : vector<8xf32>
    %67 = vector.multi_reduction <add>, %66, %cst_19 [1] : vector<8x128xf32> to vector<8xf32>
    %68 = vector.shape_cast %67 : vector<8xf32> to vector<8x1xf32>
    %c2_i32 = arith.constant 2 : i32
    %69 = vector.broadcast %c2_i32 : i32 to vector<1x4xi32>
    %70 = arith.cmpi eq, %28, %69 : vector<1x4xi32>
    %cst_20 = arith.constant 0.000000e+00 : f32
    %71 = vector.shape_cast %70 : vector<1x4xi1> to vector<1x4xi1>
    %72 = vector.broadcast %71 : vector<1x4xi1> to vector<8x4xi1>
    %73 = vector.shape_cast %68 : vector<8x1xf32> to vector<8x1xf32>
    %74 = vector.broadcast %73 : vector<8x1xf32> to vector<8x4xf32>
    %75 = vector.broadcast %cst_20 : f32 to vector<8x4xf32>
    %76 = arith.select %72, %74, %75 : vector<8x4xi1>, vector<8x4xf32>
    %77 = arith.addf %61, %76 : vector<8x4xf32>
    %c0_21 = arith.constant 0 : index
    %c768_22 = arith.constant 768 : index
    %78 = vector.load %arg1[%c0_21, %c768_22] : memref<8x1024xf32, #tpu.memory_space<vmem>>, vector<8x256xf32>
    %79 = arith.mulf %21, %78 : vector<8x256xf32>
    %80 = vector.extract_strided_slice %79 {offsets = [0, 0], sizes = [8, 128], strides = [1, 1]} : vector<8x256xf32> to vector<8x128xf32>
    %81 = vector.extract_strided_slice %79 {offsets = [0, 128], sizes = [8, 128], strides = [1, 1]} : vector<8x256xf32> to vector<8x128xf32>
    %82 = arith.addf %80, %81 : vector<8x128xf32>
    %cst_23 = arith.constant dense<0.000000e+00> : vector<8xf32>
    %83 = vector.multi_reduction <add>, %82, %cst_23 [1] : vector<8x128xf32> to vector<8xf32>
    %84 = vector.shape_cast %83 : vector<8xf32> to vector<8x1xf32>
    %c3_i32 = arith.constant 3 : i32
    %85 = vector.broadcast %c3_i32 : i32 to vector<1x4xi32>
    %86 = arith.cmpi eq, %28, %85 : vector<1x4xi32>
    %cst_24 = arith.constant 0.000000e+00 : f32
    %87 = vector.shape_cast %86 : vector<1x4xi1> to vector<1x4xi1>
    %88 = vector.broadcast %87 : vector<1x4xi1> to vector<8x4xi1>
    %89 = vector.shape_cast %84 : vector<8x1xf32> to vector<8x1xf32>
    %90 = vector.broadcast %89 : vector<8x1xf32> to vector<8x4xf32>
    %91 = vector.broadcast %cst_24 : f32 to vector<8x4xf32>
    %92 = arith.select %88, %90, %91 : vector<8x4xi1>, vector<8x4xf32>
    %93 = arith.addf %77, %92 : vector<8x4xf32>
    %94 = vector.broadcast %27 : vector<8x1xf32> to vector<8x4xf32>
    %95 = arith.mulf %93, %94 : vector<8x4xf32>
    %c0_25 = arith.constant 0 : index
    %c0_26 = arith.constant 0 : index
    %96 = vector.load %arg3[%c0_25, %c0_26] : memref<8x4xf32, #tpu.memory_space<vmem>>, vector<8x4xf32>
    tpu.vector_store %arg3[%c0_25, %c0_26], %95 {strides = array<i32>} : memref<8x4xf32, #tpu.memory_space<vmem>>, vector<8x4xf32>,
    return
  }
  func.func @transform_0(%arg0: i32) -> (i32, i32) {
    %c0_i32 = arith.constant 0 : i32
    %c0_i32_0 = arith.constant 0 : i32
    return %arg0, %c0_i32 : i32, i32
  }
  func.func @transform_1(%arg0: i32) -> (i32, i32) {
    %c0_i32 = arith.constant 0 : i32
    %c0_i32_0 = arith.constant 0 : i32
    %c0_i32_1 = arith.constant 0 : i32
    return %c0_i32, %c0_i32_0 : i32, i32
  }
  func.func @transform_2(%arg0: i32) -> (i32, i32) {
    %c0_i32 = arith.constant 0 : i32
    %c0_i32_0 = arith.constant 0 : i32
    return %arg0, %c0_i32 : i32, i32
  }
}

</mosaic_0001>

<bundles_post_ra>
// kernel: tpu_custom_call.1
= control target key start
LH: loop header
LB: loop body
LE: loop exit
PB: predicated region body
PF: predicated region fallthrough
CT: control target
= control target key end

     0   :  { %7 = vsyncpa [#allocation3], 0  ;;  %s569_s0 = inlined_call_operand.hbm [shape: f32[8,1024], index: 0, kind: input, shape index: {}]   ;;  %s570_s1 = inlined_call_operand.hbm [shape: bf16[256,256], index: 1, kind: input, shape index: {}]   ;;  %s571_s2 = inlined_call_operand.vmem [shape: f32[8,4], index: 2, kind: output, shape index: {}]  }
   0x1   :  { %8 = vsyncpa [#allocation5], 0  ;;  %s496_s9 = smov [#allocation2]   ;;  %s497_s11 = smov [#allocation4]  }
   0x2   :  { %s15_s10 = sshll.u32 %s496_s9, 4  ;;  %s24_s12 = sshll.u32 %s497_s11, 4  ;;  %s16_s10 = int_to_ptr.vmem [resolvable:$true] %s15_s10  ;;  %s515_s12 = int_to_ptr.vmem [resolvable:$true] %s24_s12 }
   0x3   :  { %s448_s15 = scalar_lea.hbm %s569_s0, 1024 }
   0x4   :  { %p449_p0 = scmp.ne.s32.totalorder %s569_s0, %s448_s15  ;;  %p452_p1 = scmp.lt.u32.totalorder %s448_s15, %s569_s0 }
   0x6   :  { %p454_p2 = pnand %p452_p1, %p449_p0 }
   0x8   :  { %457 = shalt.err (!%p454_p2)
}
   0x9   :  { %s458_s20 = scalar_lea.vmem %s16_s10, 1024  ;;  %p463_p4 = scmp.lt.s32.totalorder %s16_s10, %s16_s10 }
   0xa   :  { %p459_p3 = scmp.ne.s32.totalorder %s16_s10, %s458_s20  ;;  %p464_p5 = scmp.lt.s32.totalorder %s458_s20, %s458_s20 }
   0xc   :  { %p465_p6 = por %p464_p5, %p463_p4 }
   0xe   :  { %p466_p7 = pnand %p465_p6, %p459_p3 }
  0x10   :  { %469 = shalt.err (!%p466_p7)
}
  0x11   :  { %18 = dma.hbm_to_vmem [thread:$0]  %s569_s0, 1024, %s16_s10, [#allocation3]  }
  0x12   :  { %s470_s25 = scalar_lea.hbm %s570_s1, 4096 }
  0x13   :  { %p471_p8 = scmp.ne.s32.totalorder %s570_s1, %s470_s25  ;;  %p474_p9 = scmp.lt.u32.totalorder %s470_s25, %s570_s1 }
  0x15   :  { %p476_p10 = pnand %p474_p9, %p471_p8 }
  0x17   :  { %479 = shalt.err (!%p476_p10)
}
  0x18   :  { %s480_s30 = scalar_lea.vmem %s515_s12, 4096  ;;  %p485_p12 = scmp.lt.s32.totalorder %s515_s12, %s515_s12 }
  0x19   :  { %p481_p11 = scmp.ne.s32.totalorder %s515_s12, %s480_s30  ;;  %p486_p13 = scmp.lt.s32.totalorder %s480_s30, %s480_s30 }
  0x1b   :  { %p487_p0 = por %p486_p13, %p485_p12 }
  0x1d   :  { %p488_p1 = pnand %p487_p0, %p481_p11 }
  0x1f   :  { %491 = shalt.err (!%p488_p1)
}
  0x20   :  { %s498_s0 = smov 128   ;;  %s499_s3 = smov 8  }
  0x21   :  { %30 = dma.hbm_to_vmem [thread:$0]  %s570_s1, 4096, %s515_s12, [#allocation5], %s498_s0, %s498_s0, %s499_s3  }
  0x22   :  { %492 = dma.done.wait [#allocation3], 1024  }
  0x23   :  { %493 = vsyncadd [#allocation3], 4294966272 }
  0x24   :  { %494 = dma.done.wait [#allocation5], 4096  }
  0x25   :  { %495 = vsyncadd [#allocation5], 4294963200  ;;  %v394_v0 = vld [vmem:[#allocation4 + $0x4] ss:$8 sps:$4 sm:$0xff]   ;;  %v396_v1 = vld [vmem:[#allocation4] ss:$8 sps:$4 sm:$0xff]  }
  0x26   :  { %253 = vmatprep.subr.bf16.mxu0 %v394_v0  ;;  %v397_v2 = vld [vmem:[#allocation4 + $0x14] ss:$8 sps:$4 sm:$0xff]   ;;  %v399_v3 = vld [vmem:[#allocation4 + $0x10] ss:$8 sps:$4 sm:$0xff]   ;;  %v400_v4 = vld [vmem:[#allocation4 + $0x24] ss:$8 sps:$4 sm:$0xff]  }
  0x27   :  { %254 = vmatpush1.bf16.msra.mxu0 %v396_v1  ;;  %v402_v5 = vld [vmem:[#allocation4 + $0x20] ss:$8 sps:$4 sm:$0xff]   ;;  %v403_v6 = vld [vmem:[#allocation4 + $0x34] ss:$8 sps:$4 sm:$0xff]   ;;  %v405_v7 = vld [vmem:[#allocation4 + $0x30] ss:$8 sps:$4 sm:$0xff]  }
  0x28   :  { %255 = vmatprep.subr.bf16.mxu0 %v397_v2  ;;  %v406_v8 = vld [vmem:[#allocation4 + $0x44] ss:$8 sps:$4 sm:$0xff]   ;;  %v408_v9 = vld [vmem:[#allocation4 + $0x40] ss:$8 sps:$4 sm:$0xff]   ;;  %v409_v10 = vld [vmem:[#allocation4 + $0x54] ss:$8 sps:$4 sm:$0xff]  }
  0x29   :  { %v411_v11 = vld [vmem:[#allocation4 + $0x50] ss:$8 sps:$4 sm:$0xff]   ;;  %v412_v12 = vld [vmem:[#allocation4 + $0x64] ss:$8 sps:$4 sm:$0xff]   ;;  %v414_v19 = vld [vmem:[#allocation4 + $0x60] ss:$8 sps:$4 sm:$0xff]  }
  0x2a   :  { %v546_v13 = vld [vmem:[#allocation2 + $0x8] sm:$0xff]  ;;  %v548_v14 = vld [vmem:[#allocation2 + $0x18] sm:$0xff]  ;;  %v37_v36 = vld [vmem:[#allocation2] sm:$0xff]  ;;  %vm350_vm4 = vcmask 31744  }
  0x2b   :  { %256 = vmatpush1.bf16.msra.mxu0 %v399_v3  ;;  %v40_v15 = vmul.f32 %v546_v13, %v546_v13  ;;  %v44_v16 = vmul.f32 %v548_v14, %v548_v14  ;;  %v554_v17 = vld [vmem:[#allocation2 + $0x28] sm:$0xff]  ;;  %v556_v18 = vld [vmem:[#allocation2 + $0x38] sm:$0xff]  ;;  %v41_v37 = vld [vmem:[#allocation2 + $0x10] sm:$0xff]  ;;  %v39_v39 = vmul.f32 %v37_v36, %v37_v36 }
  0x2c   :  { %257 = vmatprep.subr.bf16.mxu0 %v400_v4  ;;  %v50_v20 = vmul.f32 %v554_v17, %v554_v17  ;;  %v415_v21 = vld [vmem:[#allocation4 + $0x74] ss:$8 sps:$4 sm:$0xff]   ;;  %v56_v23 = vmul.f32 %v556_v18, %v556_v18  ;;  %v417_v25 = vld [vmem:[#allocation4 + $0x70] ss:$8 sps:$4 sm:$0xff]   ;;  %v418_v26 = vld [vmem:[#allocation4 + $0x84] ss:$8 sps:$4 sm:$0xff]   ;;  %v43_v40 = vmul.f32 %v41_v37, %v41_v37 }
  0x2d   :  { %v46_v22 = vadd.f32 %v44_v16, %v40_v15  ;;  %v420_v29 = vld [vmem:[#allocation4 + $0x80] ss:$8 sps:$4 sm:$0xff]   ;;  %v421_v30 = vld [vmem:[#allocation4 + $0x94] ss:$8 sps:$4 sm:$0xff]   ;;  %v423_v31 = vld [vmem:[#allocation4 + $0x90] ss:$8 sps:$4 sm:$0xff]  }
  0x2e   :  { %v424_v32 = vld [vmem:[#allocation4 + $0xa4] ss:$8 sps:$4 sm:$0xff]   ;;  %v426_v33 = vld [vmem:[#allocation4 + $0xa0] ss:$8 sps:$4 sm:$0xff]   ;;  %v427_v34 = vld [vmem:[#allocation4 + $0xb4] ss:$8 sps:$4 sm:$0xff]   ;;  %v45_v44 = vadd.f32 %v43_v40, %v39_v39 }
  0x2f   :  { %258 = vmatpush1.bf16.msra.mxu0 %v402_v5  ;;  %v52_v24 = vadd.f32 %v50_v20, %v46_v22  ;;  %v429_v35 = vld [vmem:[#allocation4 + $0xb0] ss:$8 sps:$4 sm:$0xff]   ;;  %v430_v38 = vld [vmem:[#allocation4 + $0xc4] ss:$8 sps:$4 sm:$0xff]   ;;  %v432_v41 = vld [vmem:[#allocation4 + $0xc0] ss:$8 sps:$4 sm:$0xff]  }
  0x30   :  { %259 = vmatprep.subr.bf16.mxu0 %v403_v6  ;;  %v47_v42 = vld [vmem:[#allocation2 + $0x20] sm:$0xff]  ;;  %v433_v43 = vld [vmem:[#allocation4 + $0xd4] ss:$8 sps:$4 sm:$0xff]   ;;  %v435_v46 = vld [vmem:[#allocation4 + $0xd0] ss:$8 sps:$4 sm:$0xff]  }
  0x31   :  { %v58_v27 = vadd.f32 %v56_v23, %v52_v24  ;;  %v49_v45 = vmul.f32 %v47_v42, %v47_v42  ;;  %v53_v47 = vld [vmem:[#allocation2 + $0x30] sm:$0xff]  ;;  %v436_v48 = vld [vmem:[#allocation4 + $0xe4] ss:$8 sps:$4 sm:$0xff]   ;;  %v438_v51 = vld [vmem:[#allocation4 + $0xe0] ss:$8 sps:$4 sm:$0xff]  }
  0x32   :  { %v55_v50 = vmul.f32 %v53_v47, %v53_v47  ;;  %v439_v52 = vld [vmem:[#allocation4 + $0xf4] ss:$8 sps:$4 sm:$0xff]   ;;  %v441_v54 = vld [vmem:[#allocation4 + $0xf0] ss:$8 sps:$4 sm:$0xff]  }
  0x33   :  { %260 = vmatpush1.bf16.msra.mxu0 %v405_v7  ;;  %v60_v28 = vpack.c.bf16 %v58_v27, %v58_v27  ;;  %v51_v49 = vadd.f32 %v49_v45, %v45_v44 }
  0x34   :  { %261 = vmatprep.subr.bf16.mxu0 %v406_v8 }
  0x35   :  { %285 = vmatprep.mubr.bf16.mxu0 %v60_v28  ;;  %v57_v53 = vadd.f32 %v55_v50, %v51_v49 }
  0x37   :  { %262 = vmatpush1.bf16.msra.mxu0 %v408_v9  ;;  %v59_v55 = vpack.c.bf16 %v57_v53, %v57_v53 }
  0x38   :  { %263 = vmatprep.subr.bf16.mxu0 %v409_v10 }
  0x3b   :  { %264 = vmatpush1.bf16.msra.mxu0 %v411_v11 }
  0x3c   :  { %265 = vmatprep.subr.bf16.mxu0 %v412_v12 }
  0x3f   :  { %266 = vmatpush1.bf16.msra.mxu0 %v414_v19 }
  0x40   :  { %267 = vmatprep.subr.bf16.mxu0 %v415_v21  ;;  %v307_v21 = vlaneseq }
  0x42   :  { %v308_v23 = vand.u32 127, %v307_v21 }
  0x43   :  { %268 = vmatpush1.bf16.msra.mxu0 %v417_v25 }
  0x44   :  { %269 = vmatprep.subr.bf16.mxu0 %v418_v26  ;;  %vm314_vm0 = vcmp.eq.s32.totalorder %v308_v23, 0  ;;  %vm324_vm1 = vcmp.eq.s32.totalorder %v308_v23, 1  ;;  %vm334_vm2 = vcmp.eq.s32.totalorder %v308_v23, 2  ;;  %vm344_vm3 = vcmp.eq.s32.totalorder %v308_v23, 3 }
  0x47   :  { %270 = vmatpush1.bf16.msra.mxu0 %v420_v29 }
  0x48   :  { %271 = vmatprep.subr.bf16.mxu0 %v421_v30 }
  0x4b   :  { %272 = vmatpush1.bf16.msra.mxu0 %v423_v31 }
  0x4c   :  { %273 = vmatprep.subr.bf16.mxu0 %v424_v32 }
  0x4f   :  { %274 = vmatpush1.bf16.msra.mxu0 %v426_v33 }
  0x50   :  { %275 = vmatprep.subr.bf16.mxu0 %v427_v34 }
  0x53   :  { %276 = vmatpush1.bf16.msra.mxu0 %v429_v35 }
  0x54   :  { %277 = vmatprep.subr.bf16.mxu0 %v430_v38 }
  0x57   :  { %278 = vmatpush1.bf16.msra.mxu0 %v432_v41 }
  0x58   :  { %279 = vmatprep.subr.bf16.mxu0 %v433_v43 }
  0x5b   :  { %280 = vmatpush1.bf16.msra.mxu0 %v435_v46 }
  0x5c   :  { %281 = vmatprep.subr.bf16.mxu0 %v436_v48 }
  0x5f   :  { %282 = vmatpush1.bf16.msra.mxu0 %v438_v51 }
  0x60   :  { %283 = vmatprep.subr.bf16.mxu0 %v439_v52 }
  0x63   :  { %284 = vmatpush1.bf16.msra.mxu0 %v441_v54 }
  0x66   :  { %286 = vmatmul.mubr.bf16.vlgmr.msra.gmra.mrb[0].mxu0 %v59_v55 }
 0x139   :  { %v287_v56 = vpop.f32.mrb[0].mxu0 }
 0x13a   :  { %v289_v57 = vpop.f32.mrb[1].mxu0 }
 0x13b   :  { %v291_v58 = vpop.f32.mrb[2].mxu0  ;;  %v294_v59 = vmax.f32 %v287_v56, %v289_v57 }
 0x13c   :  { %v292_v60 = vpop.f32.mrb[3].mxu0 }
 0x13d   :  { %295 = vmax.xlane.f32.xlu0 %v294_v59 }
 0x1ca   :  { %v296_v61 = vpop.xlane.xlu0 %295 }
 0x1cb   :  { %v297_v62 = vsub.f32 %v287_v56, %v296_v61  ;;  %v298_v63 = vsub.f32 %v289_v57, %v296_v61 }
 0x1cd   :  { %v299_v0 = vmul.f32 1.442695, %v297_v62  ;;  %v301_v1 = vmul.f32 1.442695, %v298_v63 }
 0x1cf   :  { %442 = vpow2.f32 %v299_v0 }
 0x1d0   :  { %444 = vpow2.f32 %v301_v1 }
 0x1d9   :  { %v443_v2 = vpop.eup %442 }
 0x1da   :  { %v445_v3 = vpop.eup %444  ;;  %v309_v4 = vmul.f32 %v443_v2, %v37_v36  ;;  %v329_v5 = vmul.f32 %v443_v2, %v47_v42  ;;  %v319_v6 = vmul.f32 %v443_v2, %v41_v37  ;;  %v339_v7 = vmul.f32 %v443_v2, %v53_v47 }
 0x1db   :  { %v303_v8 = vadd.f32 %v445_v3, %v443_v2  ;;  %v310_v9 = vmul.f32 %v445_v3, %v546_v13  ;;  %v330_v10 = vmul.f32 %v445_v3, %v554_v17  ;;  %v320_v11 = vmul.f32 %v445_v3, %v548_v14 }
 0x1dc   :  { %v340_v12 = vmul.f32 %v445_v3, %v556_v18 }
 0x1dd   :  { %304 = vadd.xlane.f32.xlu0 %v303_v8  ;;  %v311_v15 = vadd.f32 %v310_v9, %v309_v4  ;;  %v331_v16 = vadd.f32 %v330_v10, %v329_v5  ;;  %v321_v19 = vadd.f32 %v320_v11, %v319_v6 }
 0x1de   :  { %v341_v20 = vadd.f32 %v340_v12, %v339_v7 }
 0x1df   :  { %312 = vadd.xlane.f32.xlu1 %v311_v15 }
 0x1e1   :  { %332 = vadd.xlane.f32.xlu0 %v331_v16 }
 0x1e3   :  { %322 = vadd.xlane.f32.xlu1 %v321_v19 }
 0x1e7   :  { %342 = vadd.xlane.f32.xlu1 %v341_v20 }
 0x26a   :  { %v305_v22 = vpop.xlane.xlu0 %304 }
 0x26b   :  { %446 = vrcp.f32 %v305_v22 }
 0x26c   :  { %v313_v24 = vpop.xlane.xlu1 %312 }
 0x26d   :  { %v317_v17 = vsel %vm314_vm0, %v313_v24, 0.0 }
 0x26e   :  { %v333_v13 = vpop.xlane.xlu0 %332 }
 0x26f   :  { %v337_v26 = vsel %vm334_vm2, %v333_v13, 0.0 }
 0x270   :  { %v323_v14 = vpop.xlane.xlu1 %322 }
 0x271   :  { %v327_v18 = vsel %vm324_vm1, %v323_v14, 0.0 }
 0x272   :  { %v328_v25 = vadd.f32 %v327_v18, %v317_v17 }
 0x274   :  { %v343_v27 = vpop.xlane.xlu1 %342  ;;  %v338_v28 = vadd.f32 %v337_v26, %v328_v25 }
 0x275   :  { %v347_v29 = vsel %vm344_vm3, %v343_v27, 0.0  ;;  %v447_v31 = vpop.eup %446 }
 0x276   :  { %v348_v30 = vadd.f32 %v347_v29, %v338_v28 }
 0x278   :  { %v349_v32 = vmul.f32 %v447_v31, %v348_v30 }
 0x27a   :  { %351 = vst.msk [vmem:[%s571_s2] sm:$0xff] %vm350_vm4, %v349_v32 }
 0x27b   :  { %356 = vsyncpa [#allocation3], 1 }
 0x27c   :  { %357 = vsyncpa [#allocation5], 1 }

// kernel: tpu_custom_call.1
= control target key start
LH: loop header
LB: loop body
LE: loop exit
PB: predicated region body
PF: predicated region fallthrough
CT: control target
= control target key end

     0   :  { %7 = vsyncpa [#allocation3], 0  ;;  %s569_s0 = inlined_call_operand.hbm [shape: f32[8,1024], index: 0, kind: input, shape index: {}]   ;;  %s570_s1 = inlined_call_operand.hbm [shape: bf16[256,256], index: 1, kind: input, shape index: {}]   ;;  %s571_s2 = inlined_call_operand.vmem [shape: f32[8,4], index: 2, kind: output, shape index: {}]  }
   0x1   :  { %8 = vsyncpa [#allocation5], 0  ;;  %s496_s9 = smov [#allocation2]   ;;  %s497_s11 = smov [#allocation4]  }
   0x2   :  { %s15_s10 = sshll.u32 %s496_s9, 4  ;;  %s24_s12 = sshll.u32 %s497_s11, 4  ;;  %s16_s10 = int_to_ptr.vmem [resolvable:$true] %s15_s10  ;;  %s515_s12 = int_to_ptr.vmem [resolvable:$true] %s24_s12 }
   0x3   :  { %s448_s15 = scalar_lea.hbm %s569_s0, 1024 }
   0x4   :  { %p449_p0 = scmp.ne.s32.totalorder %s569_s0, %s448_s15  ;;  %p452_p1 = scmp.lt.u32.totalorder %s448_s15, %s569_s0 }
   0x6   :  { %p454_p2 = pnand %p452_p1, %p449_p0 }
   0x8   :  { %457 = shalt.err (!%p454_p2)
}
   0x9   :  { %s458_s20 = scalar_lea.vmem %s16_s10, 1024  ;;  %p463_p4 = scmp.lt.s32.totalorder %s16_s10, %s16_s10 }
   0xa   :  { %p459_p3 = scmp.ne.s32.totalorder %s16_s10, %s458_s20  ;;  %p464_p5 = scmp.lt.s32.totalorder %s458_s20, %s458_s20 }
   0xc   :  { %p465_p6 = por %p464_p5, %p463_p4 }
   0xe   :  { %p466_p7 = pnand %p465_p6, %p459_p3 }
  0x10   :  { %469 = shalt.err (!%p466_p7)
}
  0x11   :  { %18 = dma.hbm_to_vmem [thread:$0]  %s569_s0, 1024, %s16_s10, [#allocation3]  }
  0x12   :  { %s470_s25 = scalar_lea.hbm %s570_s1, 4096 }
  0x13   :  { %p471_p8 = scmp.ne.s32.totalorder %s570_s1, %s470_s25  ;;  %p474_p9 = scmp.lt.u32.totalorder %s470_s25, %s570_s1 }
  0x15   :  { %p476_p10 = pnand %p474_p9, %p471_p8 }
  0x17   :  { %479 = shalt.err (!%p476_p10)
}
  0x18   :  { %s480_s30 = scalar_lea.vmem %s515_s12, 4096  ;;  %p485_p12 = scmp.lt.s32.totalorder %s515_s12, %s515_s12 }
  0x19   :  { %p481_p11 = scmp.ne.s32.totalorder %s515_s12, %s480_s30  ;;  %p486_p13 = scmp.lt.s32.totalorder %s480_s30, %s480_s30 }
  0x1b   :  { %p487_p0 = por %p486_p13, %p485_p12 }
  0x1d   :  { %p488_p1 = pnand %p487_p0, %p481_p11 }
  0x1f   :  { %491 = shalt.err (!%p488_p1)
}
  0x20   :  { %s498_s0 = smov 128   ;;  %s499_s3 = smov 8  }
  0x21   :  { %30 = dma.hbm_to_vmem [thread:$0]  %s570_s1, 4096, %s515_s12, [#allocation5], %s498_s0, %s498_s0, %s499_s3  }
  0x22   :  { %492 = dma.done.wait [#allocation3], 1024  }
  0x23   :  { %493 = vsyncadd [#allocation3], 4294966272 }
  0x24   :  { %494 = dma.done.wait [#allocation5], 4096  }
  0x25   :  { %495 = vsyncadd [#allocation5], 4294963200  ;;  %v394_v0 = vld [vmem:[#allocation4 + $0x4] ss:$8 sps:$4 sm:$0xff]   ;;  %v396_v1 = vld [vmem:[#allocation4] ss:$8 sps:$4 sm:$0xff]  }
  0x26   :  { %253 = vmatprep.subr.bf16.mxu0 %v394_v0  ;;  %v397_v2 = vld [vmem:[#allocation4 + $0x14] ss:$8 sps:$4 sm:$0xff]   ;;  %v399_v3 = vld [vmem:[#allocation4 + $0x10] ss:$8 sps:$4 sm:$0xff]   ;;  %v400_v4 = vld [vmem:[#allocation4 + $0x24] ss:$8 sps:$4 sm:$0xff]  }
  0x27   :  { %254 = vmatpush1.bf16.msra.mxu0 %v396_v1  ;;  %v402_v5 = vld [vmem:[#allocation4 + $0x20] ss:$8 sps:$4 sm:$0xff]   ;;  %v403_v6 = vld [vmem:[#allocation4 + $0x34] ss:$8 sps:$4 sm:$0xff]   ;;  %v405_v7 = vld [vmem:[#allocation4 + $0x30] ss:$8 sps:$4 sm:$0xff]  }
  0x28   :  { %255 = vmatprep.subr.bf16.mxu0 %v397_v2  ;;  %v406_v8 = vld [vmem:[#allocation4 + $0x44] ss:$8 sps:$4 sm:$0xff]   ;;  %v408_v9 = vld [vmem:[#allocation4 + $0x40] ss:$8 sps:$4 sm:$0xff]   ;;  %v409_v10 = vld [vmem:[#allocation4 + $0x54] ss:$8 sps:$4 sm:$0xff]  }
  0x29   :  { %v411_v11 = vld [vmem:[#allocation4 + $0x50] ss:$8 sps:$4 sm:$0xff]   ;;  %v412_v12 = vld [vmem:[#allocation4 + $0x64] ss:$8 sps:$4 sm:$0xff]   ;;  %v414_v19 = vld [vmem:[#allocation4 + $0x60] ss:$8 sps:$4 sm:$0xff]  }
  0x2a   :  { %v546_v13 = vld [vmem:[#allocation2 + $0x8] sm:$0xff]  ;;  %v548_v14 = vld [vmem:[#allocation2 + $0x18] sm:$0xff]  ;;  %v37_v36 = vld [vmem:[#allocation2] sm:$0xff]  ;;  %vm350_vm4 = vcmask 31744  }
  0x2b   :  { %256 = vmatpush1.bf16.msra.mxu0 %v399_v3  ;;  %v40_v15 = vmul.f32 %v546_v13, %v546_v13  ;;  %v44_v16 = vmul.f32 %v548_v14, %v548_v14  ;;  %v554_v17 = vld [vmem:[#allocation2 + $0x28] sm:$0xff]  ;;  %v556_v18 = vld [vmem:[#allocation2 + $0x38] sm:$0xff]  ;;  %v41_v37 = vld [vmem:[#allocation2 + $0x10] sm:$0xff]  ;;  %v39_v39 = vmul.f32 %v37_v36, %v37_v36 }
  0x2c   :  { %257 = vmatprep.subr.bf16.mxu0 %v400_v4  ;;  %v50_v20 = vmul.f32 %v554_v17, %v554_v17  ;;  %v415_v21 = vld [vmem:[#allocation4 + $0x74] ss:$8 sps:$4 sm:$0xff]   ;;  %v56_v23 = vmul.f32 %v556_v18, %v556_v18  ;;  %v417_v25 = vld [vmem:[#allocation4 + $0x70] ss:$8 sps:$4 sm:$0xff]   ;;  %v418_v26 = vld [vmem:[#allocation4 + $0x84] ss:$8 sps:$4 sm:$0xff]   ;;  %v43_v40 = vmul.f32 %v41_v37, %v41_v37 }
  0x2d   :  { %v46_v22 = vadd.f32 %v44_v16, %v40_v15  ;;  %v420_v29 = vld [vmem:[#allocation4 + $0x80] ss:$8 sps:$4 sm:$0xff]   ;;  %v421_v30 = vld [vmem:[#allocation4 + $0x94] ss:$8 sps:$4 sm:$0xff]   ;;  %v423_v31 = vld [vmem:[#allocation4 + $0x90] ss:$8 sps:$4 sm:$0xff]  }
  0x2e   :  { %v424_v32 = vld [vmem:[#allocation4 + $0xa4] ss:$8 sps:$4 sm:$0xff]   ;;  %v426_v33 = vld [vmem:[#allocation4 + $0xa0] ss:$8 sps:$4 sm:$0xff]   ;;  %v427_v34 = vld [vmem:[#allocation4 + $0xb4] ss:$8 sps:$4 sm:$0xff]   ;;  %v45_v44 = vadd.f32 %v43_v40, %v39_v39 }
  0x2f   :  { %258 = vmatpush1.bf16.msra.mxu0 %v402_v5  ;;  %v52_v24 = vadd.f32 %v50_v20, %v46_v22  ;;  %v429_v35 = vld [vmem:[#allocation4 + $0xb0] ss:$8 sps:$4 sm:$0xff]   ;;  %v430_v38 = vld [vmem:[#allocation4 + $0xc4] ss:$8 sps:$4 sm:$0xff]   ;;  %v432_v41 = vld [vmem:[#allocation4 + $0xc0] ss:$8 sps:$4 sm:$0xff]  }
  0x30   :  { %259 = vmatprep.subr.bf16.mxu0 %v403_v6  ;;  %v47_v42 = vld [vmem:[#allocation2 + $0x20] sm:$0xff]  ;;  %v433_v43 = vld [vmem:[#allocation4 + $0xd4] ss:$8 sps:$4 sm:$0xff]   ;;  %v435_v46 = vld [vmem:[#allocation4 + $0xd0] ss:$8 sps:$4 sm:$0xff]  }
  0x31   :  { %v58_v27 = vadd.f32 %v56_v23, %v52_v24  ;;  %v49_v45 = vmul.f32 %v47_v42, %v47_v42  ;;  %v53_v47 = vld [vmem:[#allocation2 + $0x30] sm:$0xff]  ;;  %v436_v48 = vld [vmem:[#allocation4 + $0xe4] ss:$8 sps:$4 sm:$0xff]   ;;  %v438_v51 = vld [vmem:[#allocation4 + $0xe0] ss:$8 sps:$4 sm:$0xff]  }
  0x32   :  { %v55_v50 = vmul.f32 %v53_v47, %v53_v47  ;;  %v439_v52 = vld [vmem:[#allocation4 + $0xf4] ss:$8 sps:$4 sm:$0xff]   ;;  %v441_v54 = vld [vmem:[#allocation4 + $0xf0] ss:$8 sps:$4 sm:$0xff]  }
  0x33   :  { %260 = vmatpush1.bf16.msra.mxu0 %v405_v7  ;;  %v60_v28 = vpack.c.bf16 %v58_v27, %v58_v27  ;;  %v51_v49 = vadd.f32 %v49_v45, %v45_v44 }
  0x34   :  { %261 = vmatprep.subr.bf16.mxu0 %v406_v8 }
  0x35   :  { %285 = vmatprep.mubr.bf16.mxu0 %v60_v28  ;;  %v57_v53 = vadd.f32 %v55_v50, %v51_v49 }
  0x37   :  { %262 = vmatpush1.bf16.msra.mxu0 %v408_v9  ;;  %v59_v55 = vpack.c.bf16 %v57_v53, %v57_v53 }
  0x38   :  { %263 = vmatprep.subr.bf16.mxu0 %v409_v10 }
  0x3b   :  { %264 = vmatpush1.bf16.msra.mxu0 %v411_v11 }
  0x3c   :  { %265 = vmatprep.subr.bf16.mxu0 %v412_v12 }
  0x3f   :  { %266 = vmatpush1.bf16.msra.mxu0 %v414_v19 }
  0x40   :  { %267 = vmatprep.subr.bf16.mxu0 %v415_v21  ;;  %v307_v21 = vlaneseq }
  0x42   :  { %v308_v23 = vand.u32 127, %v307_v21 }
  0x43   :  { %268 = vmatpush1.bf16.msra.mxu0 %v417_v25 }
  0x44   :  { %269 = vmatprep.subr.bf16.mxu0 %v418_v26  ;;  %vm314_vm0 = vcmp.eq.s32.totalorder %v308_v23, 0  ;;  %vm324_vm1 = vcmp.eq.s32.totalorder %v308_v23, 1  ;;  %vm334_vm2 = vcmp.eq.s32.totalorder %v308_v23, 2  ;;  %vm344_vm3 = vcmp.eq.s32.totalorder %v308_v23, 3 }
  0x47   :  { %270 = vmatpush1.bf16.msra.mxu0 %v420_v29 }
  0x48   :  { %271 = vmatprep.subr.bf16.mxu0 %v421_v30 }
  0x4b   :  { %272 = vmatpush1.bf16.msra.mxu0 %v423_v31 }
  0x4c   :  { %273 = vmatprep.subr.bf16.mxu0 %v424_v32 }
  0x4f   :  { %274 = vmatpush1.bf16.msra.mxu0 %v426_v33 }
  0x50   :  { %275 = vmatprep.subr.bf16.mxu0 %v427_v34 }
  0x53   :  { %276 = vmatpush1.bf16.msra.mxu0 %v429_v35 }
  0x54   :  { %277 = vmatprep.subr.bf16.mxu0 %v430_v38 }
  0x57   :  { %278 = vmatpush1.bf16.msra.mxu0 %v432_v41 }
  0x58   :  { %279 = vmatprep.subr.bf16.mxu0 %v433_v43 }
  0x5b   :  { %280 = vmatpush1.bf16.msra.mxu0 %v435_v46 }
  0x5c   :  { %281 = vmatprep.subr.bf16.mxu0 %v436_v48 }
  0x5f   :  { %282 = vmatpush1.bf16.msra.mxu0 %v438_v51 }
  0x60   :  { %283 = vmatprep.subr.bf16.mxu0 %v439_v52 }
  0x63   :  { %284 = vmatpush1.bf16.msra.mxu0 %v441_v54 }
  0x66   :  { %286 = vmatmul.mubr.bf16.vlgmr.msra.gmra.mrb[0].mxu0 %v59_v55 }
 0x139   :  { %v287_v56 = vpop.f32.mrb[0].mxu0 }
 0x13a   :  { %v289_v57 = vpop.f32.mrb[1].mxu0 }
 0x13b   :  { %v291_v58 = vpop.f32.mrb[2].mxu0  ;;  %v294_v59 = vmax.f32 %v287_v56, %v289_v57 }
 0x13c   :  { %v292_v60 = vpop.f32.mrb[3].mxu0 }
 0x13d   :  { %295 = vmax.xlane.f32.xlu0 %v294_v59 }
 0x1ca   :  { %v296_v61 = vpop.xlane.xlu0 %295 }
 0x1cb   :  { %v297_v62 = vsub.f32 %v287_v56, %v296_v61  ;;  %v298_v63 = vsub.f32 %v289_v57, %v296_v61 }
 0x1cd   :  { %v299_v0 = vmul.f32 1.442695, %v297_v62  ;;  %v301_v1 = vmul.f32 1.442695, %v298_v63 }
 0x1cf   :  { %442 = vpow2.f32 %v299_v0 }
 0x1d0   :  { %444 = vpow2.f32 %v301_v1 }
 0x1d9   :  { %v443_v2 = vpop.eup %442 }
 0x1da   :  { %v445_v3 = vpop.eup %444  ;;  %v309_v4 = vmul.f32 %v443_v2, %v37_v36  ;;  %v329_v5 = vmul.f32 %v443_v2, %v47_v42  ;;  %v319_v6 = vmul.f32 %v443_v2, %v41_v37  ;;  %v339_v7 = vmul.f32 %v443_v2, %v53_v47 }
 0x1db   :  { %v303_v8 = vadd.f32 %v445_v3, %v443_v2  ;;  %v310_v9 = vmul.f32 %v445_v3, %v546_v13  ;;  %v330_v10 = vmul.f32 %v445_v3, %v554_v17  ;;  %v320_v11 = vmul.f32 %v445_v3, %v548_v14 }
 0x1dc   :  { %v340_v12 = vmul.f32 %v445_v3, %v556_v18 }
 0x1dd   :  { %304 = vadd.xlane.f32.xlu0 %v303_v8  ;;  %v311_v15 = vadd.f32 %v310_v9, %v309_v4  ;;  %v331_v16 = vadd.f32 %v330_v10, %v329_v5  ;;  %v321_v19 = vadd.f32 %v320_v11, %v319_v6 }
 0x1de   :  { %v341_v20 = vadd.f32 %v340_v12, %v339_v7 }
 0x1df   :  { %312 = vadd.xlane.f32.xlu1 %v311_v15 }
 0x1e1   :  { %332 = vadd.xlane.f32.xlu0 %v331_v16 }
 0x1e3   :  { %322 = vadd.xlane.f32.xlu1 %v321_v19 }
 0x1e7   :  { %342 = vadd.xlane.f32.xlu1 %v341_v20 }
 0x26a   :  { %v305_v22 = vpop.xlane.xlu0 %304 }
 0x26b   :  { %446 = vrcp.f32 %v305_v22 }
 0x26c   :  { %v313_v24 = vpop.xlane.xlu1 %312 }
 0x26d   :  { %v317_v17 = vsel %vm314_vm0, %v313_v24, 0.0 }
 0x26e   :  { %v333_v13 = vpop.xlane.xlu0 %332 }
 0x26f   :  { %v337_v26 = vsel %vm334_vm2, %v333_v13, 0.0 }
 0x270   :  { %v323_v14 = vpop.xlane.xlu1 %322 }
 0x271   :  { %v327_v18 = vsel %vm324_vm1, %v323_v14, 0.0 }
 0x272   :  { %v328_v25 = vadd.f32 %v327_v18, %v317_v17 }
 0x274   :  { %v343_v27 = vpop.xlane.xlu1 %342  ;;  %v338_v28 = vadd.f32 %v337_v26, %v328_v25 }
 0x275   :  { %v347_v29 = vsel %vm344_vm3, %v343_v27, 0.0  ;;  %v447_v31 = vpop.eup %446 }
 0x276   :  { %v348_v30 = vadd.f32 %v347_v29, %v338_v28 }
 0x278   :  { %v349_v32 = vmul.f32 %v447_v31, %v348_v30 }
 0x27a   :  { %351 = vst.msk [vmem:[%s571_s2] sm:$0xff] %vm350_vm4, %v349_v32 }
 0x27b   :  { %356 = vsyncpa [#allocation3], 1 }
 0x27c   :  { %357 = vsyncpa [#allocation5], 1 }

</bundles_post_ra>
